<compile_context>
chip_gen: v5e
topology: v5e:2x2
jax: 0.10.0
libtpu: 0.0.40
codegen_flags: <defaults>
</compile_context>

<pallas_src>
import functools
import math

import jax
import jax.numpy as jnp
from jax.experimental import pallas as pl
from jax.experimental.pallas import tpu as pltpu

_LANE = 128
_MAX_ROW_TILE = 1024


def _round_up(x, m):
    return ((x + m - 1) // m) * m


def _pow2_floor(x):
    x = max(int(x), 1)
    return 1 << (x.bit_length() - 1)


def _pow2_ceil(x):
    x = max(int(x), 1)
    return 1 << ((x - 1).bit_length())


def _vmem_budget():
    """Return (vmem_limit_bytes, small_vmem) derived from the local chip."""
    cap = 64 * 1024 * 1024  # conservative fallback (v7x-sized VMEM)
    try:
        info = pltpu.get_tpu_info()
        cap = int(getattr(info, "vmem_capacity_bytes", cap))
    except Exception:
        pass
    small_vmem = cap < 100 * 1024 * 1024       # v7x (64 MiB) vs v5e/v6e (128 MiB)
    limit = min((cap * 3) // 4, 96 * 1024 * 1024)
    return limit, small_vmem


def _choose_tiles(rows, s_len, bytes_per_col, vmem_limit, small_vmem):
    """Pick (ROW_TILE, S_TILE). S_TILE is 128 * 2^k; ROW_TILE = rows (capped)."""
    row_tile = rows if rows <= _MAX_ROW_TILE else _MAX_ROW_TILE
    # Per-stream block-size target: big blocks amortize the ~0.35us/step grid
    # overhead; smaller on v7x's 64 MiB VMEM.
    elems_cap = (512 * 1024) if small_vmem else (1024 * 1024)
    # Double-buffered input blocks get at most ~half of the scoped VMEM limit.
    budget = max(1024, (vmem_limit // 2) // (2 * max(bytes_per_col, 1)))
    max_elems = min(elems_cap, budget)
    max_slabs = max(1, max_elems // (row_tile * _LANE))
    need_slabs = _round_up(s_len, _LANE) // _LANE
    if need_slabs <= max_slabs:
        slabs = _pow2_ceil(need_slabs)           # cover S in a single step
        if slabs > max_slabs:
            slabs = _pow2_floor(max_slabs)
    else:
        slabs = _pow2_floor(max_slabs)
    return row_tile, slabs * _LANE


def _snr_kernel(inp_ref, tgt_ref, *rest, s_len, s_tile, has_mask, need_tail_mask):
    if has_mask:
        msk_ref, sp_out, np_out, sp_acc, np_acc = rest
    else:
        sp_out, np_out, sp_acc, np_acc = rest
        msk_ref = None

    split = pl.program_id(0)
    s = pl.program_id(2)
    n_s = pl.num_programs(2)

    @pl.when(s == 0)
    def _init():
        sp_acc[...] = jnp.zeros_like(sp_acc)
        np_acc[...] = jnp.zeros_like(np_acc)

    # bf16 streams stay narrow on HBM; compute / accumulate in f32.
    x = inp_ref[...].astype(jnp.float32)        # (ROW_TILE, S_TILE)
    t = tgt_ref[...].astype(jnp.float32)
    diff = x - t
    sq_sig = x * x
    sq_noise = diff * diff

    valid = None
    if has_mask:
        valid = msk_ref[...] != 0               # matches torch mask.bool()
    if need_tail_mask:
        # Global column index of each lane; masks the ragged S tail and any
        # over-run step of the parallel split (clamped index map below).
        lane = jax.lax.broadcasted_iota(jnp.int32, (1, s_tile), 1)
        col = (split * n_s + s) * s_tile + lane
        in_range = col < s_len                  # (1, S_TILE) -> broadcasts
        valid = in_range if valid is None else jnp.logical_and(valid, in_range)
    if valid is not None:
        sq_sig = jnp.where(valid, sq_sig, 0.0)
        sq_noise = jnp.where(valid, sq_noise, 0.0)

    # Lane fold (pure VALU): halve the width until 128 lanes remain.
    w = s_tile
    while w > _LANE:
        w //= 2
        sq_sig = sq_sig[:, :w] + sq_sig[:, w:]
        sq_noise = sq_noise[:, :w] + sq_noise[:, w:]
    sp_acc[...] += sq_sig
    np_acc[...] += sq_noise

    @pl.when(s == n_s - 1)
    def _finalize():
        # One small cross-lane (XLU) reduce per row tile, only at the end.
        sp_out[...] = jnp.sum(sp_acc[...], axis=-1, keepdims=True)
        np_out[...] = jnp.sum(np_acc[...], axis=-1, keepdims=True)


def snr_loss_pallas(inp, target, mask=None, eps=1e-7, reduction="mean"):
    """Pallas implementation of snr_loss (negative SNR).

    inp:    (..., S_in)  float
    target: (..., S)     float
    mask:   (..., S)     optional (bool/float/int); None -> all ones
    """
    inp = jnp.asarray(inp)
    target = jnp.asarray(target)

    def _stream(x):  # keep bf16 narrow on HBM; everything else f32
        return x if x.dtype in (jnp.bfloat16, jnp.float32) else x.astype(jnp.float32)

    inp, target = _stream(inp), _stream(target)

    s_len = target.shape[-1]
    # Align inp's last dim with target's (zero-pad / truncate), as in the
    # PyTorch reference.  This is the only wrapper-side pad; the hot arrays
    # are never padded to tile boundaries (tails are masked in-kernel).
    if inp.shape[-1] < s_len:
        pad = [(0, 0)] * (inp.ndim - 1) + [(0, s_len - inp.shape[-1])]
        inp = jnp.pad(inp, pad)
    elif inp.shape[-1] > s_len:
        inp = inp[..., :s_len]
    inp = jnp.broadcast_to(inp, target.shape)

    lead_shape = target.shape[:-1]
    rows = int(math.prod(lead_shape))

    inp2 = inp.reshape(rows, s_len)
    tgt2 = target.reshape(rows, s_len)

    has_mask = mask is not None
    args = [inp2, tgt2]
    bytes_per_col = inp2.dtype.itemsize + tgt2.dtype.itemsize
    if has_mask:
        # TODO(synk): when the mask is a per-row length mask, pass lengths via
        # scalar prefetch and synthesize it in-kernel to drop this HBM stream.
        m = jnp.asarray(mask)
        if m.dtype == jnp.bool_:
            m = m.astype(jnp.int8)               # 1-byte mask stream
        elif m.dtype not in (jnp.float32, jnp.bfloat16, jnp.int8, jnp.int32):
            m = m.astype(jnp.float32)
        m = jnp.broadcast_to(m, target.shape).reshape(rows, s_len)
        args.append(m)
        bytes_per_col += m.dtype.itemsize

    vmem_limit, small_vmem = _vmem_budget()
    row_tile, s_tile = _choose_tiles(rows, s_len, bytes_per_col,
                                     vmem_limit, small_vmem)

    num_row_tiles = -(-rows // row_tile)
    total_s_blocks = -(-s_len // s_tile)
    # v7x megacore: with a single row tile, split the signal axis into two
    # independent halves so both TensorCores stream HBM concurrently.
    n_split = 2 if (num_row_tiles == 1 and total_s_blocks >= 2) else 1
    s_per_split = -(-total_s_blocks // n_split)
    need_tail_mask = (n_split * s_per_split * s_tile) != s_len

    if n_split == 1:
        in_map = lambda p, r, s: (r, s)
    else:
        last_s = total_s_blocks - 1
        # Clamp so the DMA never walks past the array; the over-run step is
        # fully zeroed by the in-kernel iota mask (uses the unclamped index).
        in_map = lambda p, r, s: (r, jnp.minimum(p * s_per_split + s, last_s))
    in_specs = [pl.BlockSpec((row_tile, s_tile), in_map) for _ in args]

    rows_out = num_row_tiles * row_tile
    out_shape = (jax.ShapeDtypeStruct((n_split, rows_out, 1), jnp.float32),
                 jax.ShapeDtypeStruct((n_split, rows_out, 1), jnp.float32))
    out_map = lambda p, r, s: (p, r, 0)
    out_specs = (pl.BlockSpec((None, row_tile, 1), out_map),
                 pl.BlockSpec((None, row_tile, 1), out_map))

    kernel = functools.partial(_snr_kernel, s_len=s_len, s_tile=s_tile,
                               has_mask=has_mask, need_tail_mask=need_tail_mask)

    sp_part, np_part = pl.pallas_call(
        kernel,
        out_shape=out_shape,
        grid=(n_split, num_row_tiles, s_per_split),
        in_specs=in_specs,
        out_specs=out_specs,
        scratch_shapes=[pltpu.VMEM((row_tile, _LANE), jnp.float32),
                        pltpu.VMEM((row_tile, _LANE), jnp.float32)],
        compiler_params=pltpu.CompilerParams(
            dimension_semantics=("parallel", "parallel", "arbitrary"),
            vmem_limit_bytes=vmem_limit),
    )(*args)

    # TODO(synk): the tiny (rows,)-sized log + mean/sum reduction is left to
    # XLA on purpose (fusing it in-kernel would serialize the parallel axes).
    signal_power = jnp.sum(sp_part[:, :rows, 0], axis=0)
    noise_power = jnp.sum(np_part[:, :rows, 0], axis=0) + eps
    neg_snr = -10.0 * jnp.log10(signal_power / noise_power)
    neg_snr = neg_snr.reshape(lead_shape)

    if reduction == "mean":
        return jnp.mean(neg_snr)
    if reduction == "sum":
        return jnp.sum(neg_snr)
    return neg_snr


class SNRLoss:
    """Mirror of the PyTorch SNRLoss module (eps / reduction hyperparameters)."""

    def __init__(self, eps=1e-7, reduction="mean"):
        self.eps = eps
        self.reduction = reduction

    def __call__(self, inp, target, mask=None):
        return snr_loss_pallas(inp, target, mask, eps=self.eps,
                               reduction=self.reduction)


def _snr_loss_ref(inp, target, mask=None, eps=1e-7, reduction="mean"):
    """Pure-JAX reference mirroring the PyTorch snr_loss."""
    inp = jnp.asarray(inp, jnp.float32)
    target = jnp.asarray(target, jnp.float32)
    if mask is None:
        mask = jnp.ones_like(target)
    mask = jnp.broadcast_to(jnp.asarray(mask), target.shape)
    mask = mask.astype(jnp.bool_).astype(jnp.float32)
    s_len = target.shape[-1]
    if inp.shape[-1] < s_len:
        pad = [(0, 0)] * (inp.ndim - 1) + [(0, s_len - inp.shape[-1])]
        inp = jnp.pad(inp, pad)
    elif inp.shape[-1] > s_len:
        inp = inp[..., :s_len]
    sp = jnp.sum(inp ** 2 * mask, axis=-1)
    npow = jnp.sum((inp - target) ** 2 * mask, axis=-1) + eps
    neg_snr = -10.0 * jnp.log10(sp / npow)
    if reduction == "mean":
        return jnp.mean(neg_snr)
    elif reduction == "sum":
        return jnp.sum(neg_snr)
    return neg_snr


if __name__ == "__main__":
    key = jax.random.PRNGKey(0)
    k1, k2, k3, k4 = jax.random.split(key, 4)

    batch, num_leads, sig_len = 2, 4, 256
    target = jax.random.normal(k1, (batch, num_leads, sig_len), dtype=jnp.float32)
    # prediction = target + small noise; shorter last dim exercises pad path.
    inp = target[..., : sig_len - 16] + 0.1 * jax.random.normal(
        k2, (batch, num_leads, sig_len - 16), dtype=jnp.float32)
    # mask: zero out the tail of each signal.
    mask = (jnp.arange(sig_len)[None, None, :] < (sig_len - 32)).astype(jnp.float32)
    mask = jnp.broadcast_to(mask, (batch, num_leads, sig_len))

    # masked, mean (via the module-style wrapper)
    loss = jax.block_until_ready(SNRLoss(eps=1e-7, reduction="mean")(inp, target, mask))
    ref = _snr_loss_ref(inp, target, mask, eps=1e-7, reduction="mean")
    assert jnp.allclose(loss, ref, rtol=1e-3, atol=1e-3), (loss, ref)

    # masked, none
    loss_none = jax.block_until_ready(
        snr_loss_pallas(inp, target, mask, eps=1e-7, reduction="none"))
    ref_none = _snr_loss_ref(inp, target, mask, eps=1e-7, reduction="none")
    assert loss_none.shape == (batch, num_leads)
    assert jnp.allclose(loss_none, ref_none, rtol=1e-3, atol=1e-3), (loss_none, ref_none)

    # no mask, sum (2-stream kernel variant: mask stream removed)
    loss_nm = jax.block_until_ready(
        snr_loss_pallas(inp, target, None, eps=1e-7, reduction="sum"))
    ref_nm = _snr_loss_ref(inp, target, None, eps=1e-7, reduction="sum")
    assert jnp.allclose(loss_nm, ref_nm, rtol=1e-3, atol=1e-3), (loss_nm, ref_nm)

    # Long-signal case: exercises multi-block signal tiling, the 2-way
    # parallel S split, the clamped index map and the in-kernel tail mask
    # (300000 is not a multiple of 128, and no wrapper padding is done).
    long_len = 300_000
    tgt_l = jax.random.normal(k3, (batch, num_leads, long_len), dtype=jnp.float32)
    inp_l = tgt_l + 0.05 * jax.random.normal(k4, tgt_l.shape, dtype=jnp.float32)
    loss_l = jax.block_until_ready(
        snr_loss_pallas(inp_l, tgt_l, None, eps=1e-7, reduction="none"))
    ref_l = _snr_loss_ref(inp_l, tgt_l, None, eps=1e-7, reduction="none")
    assert jnp.allclose(loss_l, ref_l, rtol=1e-3, atol=1e-3), (loss_l, ref_l)

    print("KERNEL_OK")
</pallas_src>

<mosaic_0001>
module attributes {stable_mosaic.version = 11 : i64} {
  func.func @_snr_kernel(%arg0: i32, %arg1: i32, %arg2: i32, %arg3: memref<8x256xf32, #tpu.memory_space<vmem>>, %arg4: memref<8x256xf32, #tpu.memory_space<vmem>>, %arg5: memref<8x256xf32, #tpu.memory_space<vmem>>, %arg6: memref<1x8x1xf32, #tpu.memory_space<vmem>>, %arg7: memref<1x8x1xf32, #tpu.memory_space<vmem>>, %arg8: memref<8x128xf32, #tpu.memory_space<vmem>>, %arg9: memref<8x128xf32, #tpu.memory_space<vmem>>) attributes {dimension_semantics = [#tpu.dimension_semantics<parallel>, #tpu.dimension_semantics<parallel>, #tpu.dimension_semantics<arbitrary>], iteration_bounds = array<i64: 1, 1, 1>, scalar_prefetch = 0 : i64, scratch_operands = 2 : i64, tpu.core_type = #tpu.core_type<tc>, window_params = [{transform_indices = @transform_0, window_bounds = array<i64: 8, 256>}, {transform_indices = @transform_1, window_bounds = array<i64: 8, 256>}, {transform_indices = @transform_2, window_bounds = array<i64: 8, 256>}, {transform_indices = @transform_3, window_bounds = array<i64: 1, 8, 1>}, {transform_indices = @transform_4, window_bounds = array<i64: 1, 8, 1>}]} {
    %c0_i32 = arith.constant 0 : i32
    %0 = arith.cmpi eq, %arg2, %c0_i32 : i32
    %1 = arith.extui %0 : i1 to i32
    %c0_i32_0 = arith.constant 0 : i32
    %2 = arith.cmpi ne, %1, %c0_i32_0 : i32
    scf.if %2 {
      %cst_18 = arith.constant 0.000000e+00 : f32
      %30 = vector.broadcast %cst_18 : f32 to vector<8x128xf32>
      %c0_19 = arith.constant 0 : index
      %c0_20 = arith.constant 0 : index
      %31 = vector.load %arg8[%c0_19, %c0_20] : memref<8x128xf32, #tpu.memory_space<vmem>>, vector<8x128xf32>
      tpu.vector_store %arg8[%c0_19, %c0_20], %30 {strides = array<i32>} : memref<8x128xf32, #tpu.memory_space<vmem>>, vector<8x128xf32>,
      %cst_21 = arith.constant 0.000000e+00 : f32
      %32 = vector.broadcast %cst_21 : f32 to vector<8x128xf32>
      %c0_22 = arith.constant 0 : index
      %c0_23 = arith.constant 0 : index
      %33 = vector.load %arg9[%c0_22, %c0_23] : memref<8x128xf32, #tpu.memory_space<vmem>>, vector<8x128xf32>
      tpu.vector_store %arg9[%c0_22, %c0_23], %32 {strides = array<i32>} : memref<8x128xf32, #tpu.memory_space<vmem>>, vector<8x128xf32>,
    } else {
    }
    %c0 = arith.constant 0 : index
    %c0_1 = arith.constant 0 : index
    %3 = vector.load %arg3[%c0, %c0_1] : memref<8x256xf32, #tpu.memory_space<vmem>>, vector<8x256xf32>
    %c0_2 = arith.constant 0 : index
    %c0_3 = arith.constant 0 : index
    %4 = vector.load %arg4[%c0_2, %c0_3] : memref<8x256xf32, #tpu.memory_space<vmem>>, vector<8x256xf32>
    %5 = arith.subf %3, %4 : vector<8x256xf32>
    %6 = arith.mulf %3, %3 : vector<8x256xf32>
    %7 = arith.mulf %5, %5 : vector<8x256xf32>
    %c0_4 = arith.constant 0 : index
    %c0_5 = arith.constant 0 : index
    %8 = vector.load %arg5[%c0_4, %c0_5] : memref<8x256xf32, #tpu.memory_space<vmem>>, vector<8x256xf32>
    %cst = arith.constant 0.000000e+00 : f32
    %9 = vector.broadcast %cst : f32 to vector<8x256xf32>
    %10 = arith.cmpf one, %8, %9 : vector<8x256xf32>
    %cst_6 = arith.constant 0.000000e+00 : f32
    %11 = vector.broadcast %cst_6 : f32 to vector<8x256xf32>
    %12 = arith.select %10, %6, %11 : vector<8x256xi1>, vector<8x256xf32>
    %cst_7 = arith.constant 0.000000e+00 : f32
    %13 = vector.broadcast %cst_7 : f32 to vector<8x256xf32>
    %14 = arith.select %10, %7, %13 : vector<8x256xi1>, vector<8x256xf32>
    %15 = vector.extract_strided_slice %12 {offsets = [0, 0], sizes = [8, 128], strides = [1, 1]} : vector<8x256xf32> to vector<8x128xf32>
    %16 = vector.extract_strided_slice %12 {offsets = [0, 128], sizes = [8, 128], strides = [1, 1]} : vector<8x256xf32> to vector<8x128xf32>
    %17 = arith.addf %15, %16 : vector<8x128xf32>
    %18 = vector.extract_strided_slice %14 {offsets = [0, 0], sizes = [8, 128], strides = [1, 1]} : vector<8x256xf32> to vector<8x128xf32>
    %19 = vector.extract_strided_slice %14 {offsets = [0, 128], sizes = [8, 128], strides = [1, 1]} : vector<8x256xf32> to vector<8x128xf32>
    %20 = arith.addf %18, %19 : vector<8x128xf32>
    %c0_8 = arith.constant 0 : index
    %c0_9 = arith.constant 0 : index
    %21 = vector.load %arg8[%c0_8, %c0_9] : memref<8x128xf32, #tpu.memory_space<vmem>>, vector<8x128xf32>
    %22 = arith.addf %21, %17 : vector<8x128xf32>
    %c0_10 = arith.constant 0 : index
    %c0_11 = arith.constant 0 : index
    %23 = vector.load %arg8[%c0_10, %c0_11] : memref<8x128xf32, #tpu.memory_space<vmem>>, vector<8x128xf32>
    tpu.vector_store %arg8[%c0_10, %c0_11], %22 {strides = array<i32>} : memref<8x128xf32, #tpu.memory_space<vmem>>, vector<8x128xf32>,
    %c0_12 = arith.constant 0 : index
    %c0_13 = arith.constant 0 : index
    %24 = vector.load %arg9[%c0_12, %c0_13] : memref<8x128xf32, #tpu.memory_space<vmem>>, vector<8x128xf32>
    %25 = arith.addf %24, %20 : vector<8x128xf32>
    %c0_14 = arith.constant 0 : index
    %c0_15 = arith.constant 0 : index
    %26 = vector.load %arg9[%c0_14, %c0_15] : memref<8x128xf32, #tpu.memory_space<vmem>>, vector<8x128xf32>
    tpu.vector_store %arg9[%c0_14, %c0_15], %25 {strides = array<i32>} : memref<8x128xf32, #tpu.memory_space<vmem>>, vector<8x128xf32>,
    %c0_i32_16 = arith.constant 0 : i32
    %27 = arith.cmpi eq, %arg2, %c0_i32_16 : i32
    %28 = arith.extui %27 : i1 to i32
    %c0_i32_17 = arith.constant 0 : i32
    %29 = arith.cmpi ne, %28, %c0_i32_17 : i32
    scf.if %29 {
      %c0_18 = arith.constant 0 : index
      %c0_19 = arith.constant 0 : index
      %30 = vector.load %arg8[%c0_18, %c0_19] : memref<8x128xf32, #tpu.memory_space<vmem>>, vector<8x128xf32>
      %cst_20 = arith.constant dense<0.000000e+00> : vector<8xf32>
      %31 = vector.multi_reduction <add>, %30, %cst_20 [1] : vector<8x128xf32> to vector<8xf32>
      %32 = vector.shape_cast %31 : vector<8xf32> to vector<8x1xf32>
      %c0_21 = arith.constant 0 : index
      %c0_22 = arith.constant 0 : index
      %c0_23 = arith.constant 0 : index
      %33 = vector.load %arg6[%c0_21, %c0_22, %c0_23] : memref<1x8x1xf32, #tpu.memory_space<vmem>>, vector<1x8x1xf32>
      %34 = vector.shape_cast %33 : vector<1x8x1xf32> to vector<8x1xf32>
      %35 = vector.shape_cast %32 : vector<8x1xf32> to vector<1x8x1xf32>
      tpu.vector_store %arg6[%c0_21, %c0_22, %c0_23], %35 {strides = array<i32>} : memref<1x8x1xf32, #tpu.memory_space<vmem>>, vector<1x8x1xf32>,
      %c0_24 = arith.constant 0 : index
      %c0_25 = arith.constant 0 : index
      %36 = vector.load %arg9[%c0_24, %c0_25] : memref<8x128xf32, #tpu.memory_space<vmem>>, vector<8x128xf32>
      %cst_26 = arith.constant dense<0.000000e+00> : vector<8xf32>
      %37 = vector.multi_reduction <add>, %36, %cst_26 [1] : vector<8x128xf32> to vector<8xf32>
      %38 = vector.shape_cast %37 : vector<8xf32> to vector<8x1xf32>
      %c0_27 = arith.constant 0 : index
      %c0_28 = arith.constant 0 : index
      %c0_29 = arith.constant 0 : index
      %39 = vector.load %arg7[%c0_27, %c0_28, %c0_29] : memref<1x8x1xf32, #tpu.memory_space<vmem>>, vector<1x8x1xf32>
      %40 = vector.shape_cast %39 : vector<1x8x1xf32> to vector<8x1xf32>
      %41 = vector.shape_cast %38 : vector<8x1xf32> to vector<1x8x1xf32>
      tpu.vector_store %arg7[%c0_27, %c0_28, %c0_29], %41 {strides = array<i32>} : memref<1x8x1xf32, #tpu.memory_space<vmem>>, vector<1x8x1xf32>,
    } else {
    }
    return
  }
  func.func @transform_0(%arg0: i32, %arg1: i32, %arg2: i32) -> (i32, i32) {
    %c0_i32 = arith.constant 0 : i32
    return %arg1, %arg2 : i32, i32
  }
  func.func @transform_1(%arg0: i32, %arg1: i32, %arg2: i32) -> (i32, i32) {
    %c0_i32 = arith.constant 0 : i32
    return %arg1, %arg2 : i32, i32
  }
  func.func @transform_2(%arg0: i32, %arg1: i32, %arg2: i32) -> (i32, i32) {
    %c0_i32 = arith.constant 0 : i32
    return %arg1, %arg2 : i32, i32
  }
  func.func @transform_3(%arg0: i32, %arg1: i32, %arg2: i32) -> (i32, i32, i32) {
    %c0_i32 = arith.constant 0 : i32
    %c0_i32_0 = arith.constant 0 : i32
    return %arg0, %arg1, %c0_i32 : i32, i32, i32
  }
  func.func @transform_4(%arg0: i32, %arg1: i32, %arg2: i32) -> (i32, i32, i32) {
    %c0_i32 = arith.constant 0 : i32
    %c0_i32_0 = arith.constant 0 : i32
    return %arg0, %arg1, %c0_i32 : i32, i32, i32
  }
}

</mosaic_0001>

<bundles_post_ra>
// kernel: tpu_custom_call.1
= control target key start
LH: loop header
LB: loop body
LE: loop exit
PB: predicated region body
PF: predicated region fallthrough
CT: control target
= control target key end

     0   :  { %10 = vsyncpa [#allocation5], 0  ;;  %s233_s0 = inlined_call_operand.hbm [shape: f32[8,256], index: 0, kind: input, shape index: {}]   ;;  %s234_s1 = inlined_call_operand.hbm [shape: f32[8,256], index: 1, kind: input, shape index: {}]   ;;  %s235_s2 = inlined_call_operand.hbm [shape: f32[8,256], index: 2, kind: input, shape index: {}]   ;;  %s236_s3 = inlined_call_operand.vmem [shape: f32[1,8,1], index: 3, kind: output, shape index: {0}]   ;;  %s237_s4 = inlined_call_operand.vmem [shape: f32[1,8,1], index: 4, kind: output, shape index: {1}]  }
   0x1   :  { %11 = vsyncpa [#allocation7], 0  ;;  %s28_s17 = sshll.u32 %s234_s1, 4  ;;  %s190_s18 = smov [#allocation6]   ;;  %s29_s17 = int_to_ptr.hbm [resolvable:$true] %s28_s17 }
   0x2   :  { %s30_s19 = sshll.u32 %s190_s18, 4  ;;  %s17_s22 = sshll.u32 %s233_s0, 4  ;;  %s31_s19 = int_to_ptr.vmem [resolvable:$true] %s30_s19  ;;  %s18_s22 = int_to_ptr.hbm [resolvable:$true] %s17_s22 }
   0x3   :  { %33 = dma.hbm_to_vmem [thread:$0]  %s29_s17, 256, %s31_s19, [#allocation7]  }
   0x4   :  { %s191_s23 = smov [#allocation4]   ;;  %s39_s27 = sshll.u32 %s235_s2, 4  ;;  %s40_s27 = int_to_ptr.hbm [resolvable:$true] %s39_s27 }
   0x5   :  { %s19_s24 = sshll.u32 %s191_s23, 4  ;;  %s192_s1 = smov [#allocation8]   ;;  %s20_s24 = int_to_ptr.vmem [resolvable:$true] %s19_s24 }
   0x6   :  { %22 = dma.hbm_to_vmem [thread:$0]  %s18_s22, 256, %s20_s24, [#allocation5]  }
   0x7   :  { %s41_s28 = sshll.u32 %s192_s1, 4  ;;  %s42_s28 = int_to_ptr.vmem [resolvable:$true] %s41_s28 }
   0x8   :  { %44 = dma.hbm_to_vmem [thread:$0]  %s40_s27, 256, %s42_s28, [#allocation7]  }
   0x9   :  { %186 = dma.done.wait [#allocation5], 256  }
   0xa   :  { %187 = vsyncadd [#allocation5], 4294967040 }
   0xb   :  { %188 = dma.done.wait [#allocation7], 512  }
   0xc   :  { %189 = vsyncadd [#allocation7], 4294966784  ;;  %v63_v0 = vld [vmem:[#allocation4] sm:$0xff]  ;;  %v64_v1 = vld [vmem:[#allocation4 + $0x8] sm:$0xff]  ;;  %vm95_vm2 = vcmask 7168  }
   0xd   :  { %v73_v2 = vld [vmem:[#allocation8] sm:$0xff]  ;;  %v69_v3 = vmul.f32 %v63_v0, %v63_v0  ;;  %v70_v4 = vmul.f32 %v64_v1, %v64_v1  ;;  %v74_v5 = vld [vmem:[#allocation8 + $0x8] sm:$0xff]  ;;  %v65_v6 = vld [vmem:[#allocation6] sm:$0xff] }
   0xe   :  { %vm75_vm0 = vcmp.ne.f32.partialorder %v73_v2, 0.0  ;;  %v66_v7 = vld [vmem:[#allocation6 + $0x8] sm:$0xff]  ;;  %vm76_vm1 = vcmp.ne.f32.partialorder %v74_v5, 0.0  ;;  %v67_v8 = vsub.f32 %v63_v0, %v65_v6 }
   0xf   :  { %v68_v9 = vsub.f32 %v64_v1, %v66_v7  ;;  %v77_v10 = vsel %vm75_vm0, %v69_v3, 0.0  ;;  %v78_v11 = vsel %vm76_vm1, %v70_v4, 0.0 }
  0x10   :  { %v81_v12 = vadd.f32 %v78_v11, %v77_v10  ;;  %v71_v13 = vmul.f32 %v67_v8, %v67_v8 }
  0x11   :  { %v72_v14 = vmul.f32 %v68_v9, %v68_v9 }
  0x12   :  { %93 = vadd.xlane.f32.xlu0 %v81_v12  ;;  %v79_v15 = vsel %vm75_vm0, %v71_v13, 0.0 }
  0x13   :  { %v80_v16 = vsel %vm76_vm1, %v72_v14, 0.0 }
  0x14   :  { %v82_v17 = vadd.f32 %v80_v16, %v79_v15 }
  0x1a   :  { %98 = vadd.xlane.f32.xlu0 %v82_v17 }
  0x85   :  { %v94_v18 = vpop.xlane.xlu0 %93 }
  0x86   :  { %96 = vst.msk [vmem:[%s236_s3] sm:$0xff] %vm95_vm2, %v94_v18 }
  0x8d   :  { %v99_v19 = vpop.xlane.xlu0 %98 }
  0x8e   :  { %100 = vst.msk [vmem:[%s237_s4] sm:$0xff] %vm95_vm2, %v99_v19 }
  0x8f   :  { %109 = vsyncpa [#allocation5], 1 }
  0x90   :  { %110 = vsyncpa [#allocation7], 1 }

</bundles_post_ra>
